<compile_context>
chip_gen: v7x
topology: tpu7x:2x2x1
jax: 0.10.0
libtpu: 0.0.40
codegen_flags: <defaults>
</compile_context>

<pallas_src>
import functools

import jax
import jax.numpy as jnp
from jax.experimental import pallas as pl
from jax.experimental.pallas import tpu as pltpu


def _round_up(x, m):
    return (x + m - 1) // m * m


def _pick_tm(M):
    # Small M: one minimally padded tile (multiple of 8 sublanes).
    if M <= 512:
        return _round_up(M, 8)
    # Large M: candidate minimizing padding waste; tie -> bigger tile
    # (better MXU fill, fewer weight re-streams).
    return min((512, 256, 128), key=lambda t: (_round_up(M, t) - M, -t))


def _pick_tn(N, single_m_tile):
    Np = _round_up(N, 128)
    if N <= 512:
        tn = Np
    else:
        tn = min((512, 256), key=lambda t: (_round_up(N, t) - N, -t))
    if single_m_tile and Np >= 256:
        # v7x megacore: keep >=2 tiles on a parallel axis when M collapses to
        # a single tile (no effect on single-TC v5e/v6e).
        tn = min(tn, max(128, _round_up(Np // 2, 128)))
    return tn


def _pick_tk(K):
    Kp = _round_up(K, 128)
    if K <= 1024:
        return Kp
    return min((1024, 512, 256), key=lambda t: (_round_up(K, t) - K, -t))


def _ste_linear_kernel(x_ref, w_ref, b_ref, o_ref):
    # x_ref : (tm, tk)   w_ref : (tk, tn) pre-averaged, pre-transposed weight
    # b_ref : (1, tn)    o_ref : (tm, tn) f32 -- doubles as the K accumulator
    k = pl.program_id(2)

    @pl.when(k == 0)
    def _():
        o_ref[...] = jnp.zeros_like(o_ref)

    o_ref[...] += jnp.dot(
        x_ref[...],
        w_ref[...],
        preferred_element_type=jnp.float32,
        precision=jax.lax.Precision.HIGHEST,
    )

    @pl.when(k == pl.num_programs(2) - 1)
    def _():
        o_ref[...] += b_ref[...]


@functools.partial(jax.jit, static_argnames=("use_pallas",))
def ste_linear_forward(x, w_0, b_0, w_1, b_1, p_in, p_out, use_pallas=None):
    """Forward of STELinear (torch.nn.Linear layer type)."""
    M, K = x.shape
    N = w_0.shape[0]

    # --- parameter glue (plain JAX / XLA) ------------------------------------
    # Two chained axis-wise takes (vectorized gathers) == w_1[p_out, :][:, p_in];
    # average fused here (weight is materialized once, never twice).
    w1p = jnp.take(jnp.take(w_1, p_out, axis=0), p_in, axis=1)   # (N, K)
    w_avg_t = (0.5 * (w_0 + w1p)).T                              # (K, N)
    b_for = 0.5 * (b_0 + b_1[p_out])                             # (N,)

    if use_pallas is None:
        # One padded tile would cover the whole problem -> launch/pad overhead
        # dominates; let XLA fuse gather+average+matmul instead.
        use_pallas = not (M <= 128 and N <= 256 and K <= 256)

    if not use_pallas:
        return (
            jnp.dot(x, w_avg_t, preferred_element_type=jnp.float32,
                    precision=jax.lax.Precision.HIGHEST)
            + b_for[None, :]
        )

    # --- tile plan ------------------------------------------------------------
    tm = _pick_tm(M)
    Mp = _round_up(M, tm)
    tn = _pick_tn(N, single_m_tile=(Mp // tm == 1))
    tk = _pick_tk(K)
    Np, Kp = _round_up(N, tn), _round_up(K, tk)

    # Zero-pad only when needed (padded K/N contribute exact zeros).
    x_p = x if (Mp == M and Kp == K) else jnp.pad(x, ((0, Mp - M), (0, Kp - K)))
    w_p = (w_avg_t if (Kp == K and Np == N)
           else jnp.pad(w_avg_t, ((0, Kp - K), (0, Np - N))))
    b_p = (b_for if Np == N else jnp.pad(b_for, (0, Np - N))).reshape(1, Np)

    grid = (Mp // tm, Np // tn, Kp // tk)

    out = pl.pallas_call(
        _ste_linear_kernel,
        out_shape=jax.ShapeDtypeStruct((Mp, Np), jnp.float32),
        grid_spec=pltpu.PrefetchScalarGridSpec(
            num_scalar_prefetch=0,
            grid=grid,
            in_specs=[
                pl.BlockSpec((tm, tk), lambda i, j, k: (i, k)),   # x tile
                pl.BlockSpec((tk, tn), lambda i, j, k: (k, j)),   # avg weight^T
                pl.BlockSpec((1, tn), lambda i, j, k: (0, j)),    # bias tile
            ],
            out_specs=pl.BlockSpec((tm, tn), lambda i, j, k: (i, j)),
        ),
        compiler_params=pltpu.CompilerParams(
            dimension_semantics=("parallel", "parallel", "arbitrary"),
            vmem_limit_bytes=48 * 1024 * 1024,
        ),
    )(x_p, w_p, b_p)

    if Mp == M and Np == N:
        return out
    return out[:M, :N]


def _reference(x, w_0, b_0, w_1, b_1, p_in, p_out):
    w_for = 0.5 * (w_0 + w_1[p_out, :][:, p_in])
    b_for = 0.5 * (b_0 + b_1[p_out])
    return x @ w_for.T + b_for


if __name__ == "__main__":
    key = jax.random.PRNGKey(0)

    # --- primary small case consistent with the module: batch=8, in=32, out=32
    batch, in_features, out_features = 8, 32, 32
    k_x, k_w0, k_b0, k_w1, k_b1, k_pin, k_pout = jax.random.split(key, 7)
    x = jax.random.normal(k_x, (batch, in_features), dtype=jnp.float32)
    w_0 = jax.random.normal(k_w0, (out_features, in_features), dtype=jnp.float32)
    b_0 = jax.random.normal(k_b0, (out_features,), dtype=jnp.float32)
    w_1 = jax.random.normal(k_w1, (out_features, in_features), dtype=jnp.float32)
    b_1 = jax.random.normal(k_b1, (out_features,), dtype=jnp.float32)
    p_in = jax.random.permutation(k_pin, in_features)
    p_out = jax.random.permutation(k_pout, out_features)

    y_ref = _reference(x, w_0, b_0, w_1, b_1, p_in, p_out)

    # Force the Pallas kernel (exercises the kernel at the deployed shape).
    y_pallas = jax.block_until_ready(
        ste_linear_forward(x, w_0, b_0, w_1, b_1, p_in, p_out, use_pallas=True))
    assert jnp.allclose(y_pallas, y_ref, atol=1e-5, rtol=1e-5), "pallas mismatch"

    # Auto dispatch: this shape takes the fused-XLA fast path.
    y_auto = jax.block_until_ready(
        ste_linear_forward(x, w_0, b_0, w_1, b_1, p_in, p_out))
    assert jnp.allclose(y_auto, y_ref, atol=1e-5, rtol=1e-5), "fast-path mismatch"

    # --- secondary case: exercises padding + multi-tile N grid in the kernel.
    M2, K2, N2 = 192, 384, 320
    k2 = jax.random.split(key, 8)[-1]
    k_x2, k_w02, k_b02, k_w12, k_b12, k_pin2, k_pout2 = jax.random.split(k2, 7)
    x2 = jax.random.normal(k_x2, (M2, K2), dtype=jnp.float32)
    w_02 = jax.random.normal(k_w02, (N2, K2), dtype=jnp.float32)
    b_02 = jax.random.normal(k_b02, (N2,), dtype=jnp.float32)
    w_12 = jax.random.normal(k_w12, (N2, K2), dtype=jnp.float32)
    b_12 = jax.random.normal(k_b12, (N2,), dtype=jnp.float32)
    p_in2 = jax.random.permutation(k_pin2, K2)
    p_out2 = jax.random.permutation(k_pout2, N2)

    y2 = jax.block_until_ready(
        ste_linear_forward(x2, w_02, b_02, w_12, b_12, p_in2, p_out2,
                           use_pallas=True))
    y2_ref = _reference(x2, w_02, b_02, w_12, b_12, p_in2, p_out2)
    assert jnp.allclose(y2, y2_ref, atol=1e-4, rtol=1e-5), "pallas mismatch (case 2)"

    print("KERNEL_OK")
</pallas_src>

<mosaic_0001>
module attributes {stable_mosaic.version = 11 : i64} {
  func.func @_ste_linear_kernel(%arg0: i32, %arg1: i32, %arg2: i32, %arg3: memref<8x128xf32, #tpu.memory_space<vmem>>, %arg4: memref<128x128xf32, #tpu.memory_space<vmem>>, %arg5: memref<1x128xf32, #tpu.memory_space<vmem>>, %arg6: memref<8x128xf32, #tpu.memory_space<vmem>>) attributes {dimension_semantics = [#tpu.dimension_semantics<parallel>, #tpu.dimension_semantics<parallel>, #tpu.dimension_semantics<arbitrary>], iteration_bounds = array<i64: 1, 1, 1>, scalar_prefetch = 0 : i64, scratch_operands = 0 : i64, tpu.core_type = #tpu.core_type<tc>, window_params = [{transform_indices = @transform_0, window_bounds = array<i64: 8, 128>}, {transform_indices = @transform_1, window_bounds = array<i64: 128, 128>}, {transform_indices = @transform_2, window_bounds = array<i64: 1, 128>}, {transform_indices = @transform_3, window_bounds = array<i64: 8, 128>}]} {
    %c0_i32 = arith.constant 0 : i32
    %0 = arith.cmpi eq, %arg2, %c0_i32 : i32
    %1 = arith.extui %0 : i1 to i32
    %c0_i32_0 = arith.constant 0 : i32
    %2 = arith.cmpi ne, %1, %c0_i32_0 : i32
    scf.if %2 {
      %cst_10 = arith.constant 0.000000e+00 : f32
      %12 = vector.broadcast %cst_10 : f32 to vector<8x128xf32>
      %c0_11 = arith.constant 0 : index
      %c0_12 = arith.constant 0 : index
      %13 = vector.load %arg6[%c0_11, %c0_12] : memref<8x128xf32, #tpu.memory_space<vmem>>, vector<8x128xf32>
      tpu.vector_store %arg6[%c0_11, %c0_12], %12 {strides = array<i32>} : memref<8x128xf32, #tpu.memory_space<vmem>>, vector<8x128xf32>,
    } else {
    }
    %c0 = arith.constant 0 : index
    %c0_1 = arith.constant 0 : index
    %3 = vector.load %arg6[%c0, %c0_1] : memref<8x128xf32, #tpu.memory_space<vmem>>, vector<8x128xf32>
    %c0_2 = arith.constant 0 : index
    %c0_3 = arith.constant 0 : index
    %4 = vector.load %arg3[%c0_2, %c0_3] : memref<8x128xf32, #tpu.memory_space<vmem>>, vector<8x128xf32>
    %c0_4 = arith.constant 0 : index
    %c0_5 = arith.constant 0 : index
    %5 = vector.load %arg4[%c0_4, %c0_5] : memref<128x128xf32, #tpu.memory_space<vmem>>, vector<128x128xf32>
    %cst = arith.constant dense<0.000000e+00> : vector<8x128xf32>
    %6 = tpu.matmul %4, %5, %cst {dimension_numbers = #tpu.dot_dimension_numbers<[1], [0], [0], [1], [0, 0, 1, 1], [], []>, precision = #tpu.contract_precision<fp32>} : vector<8x128xf32>, vector<128x128xf32>, vector<8x128xf32> -> vector<8x128xf32>
    %7 = arith.addf %3, %6 : vector<8x128xf32>
    %c0_6 = arith.constant 0 : index
    %c0_7 = arith.constant 0 : index
    %8 = vector.load %arg6[%c0_6, %c0_7] : memref<8x128xf32, #tpu.memory_space<vmem>>, vector<8x128xf32>
    tpu.vector_store %arg6[%c0_6, %c0_7], %7 {strides = array<i32>} : memref<8x128xf32, #tpu.memory_space<vmem>>, vector<8x128xf32>,
    %c0_i32_8 = arith.constant 0 : i32
    %9 = arith.cmpi eq, %arg2, %c0_i32_8 : i32
    %10 = arith.extui %9 : i1 to i32
    %c0_i32_9 = arith.constant 0 : i32
    %11 = arith.cmpi ne, %10, %c0_i32_9 : i32
    scf.if %11 {
      %c0_10 = arith.constant 0 : index
      %c0_11 = arith.constant 0 : index
      %12 = vector.load %arg6[%c0_10, %c0_11] : memref<8x128xf32, #tpu.memory_space<vmem>>, vector<8x128xf32>
      %c0_12 = arith.constant 0 : index
      %c0_13 = arith.constant 0 : index
      %13 = vector.load %arg5[%c0_12, %c0_13] : memref<1x128xf32, #tpu.memory_space<vmem>>, vector<1x128xf32>
      %14 = vector.broadcast %13 : vector<1x128xf32> to vector<8x128xf32>
      %15 = arith.addf %12, %14 : vector<8x128xf32>
      %c0_14 = arith.constant 0 : index
      %c0_15 = arith.constant 0 : index
      %16 = vector.load %arg6[%c0_14, %c0_15] : memref<8x128xf32, #tpu.memory_space<vmem>>, vector<8x128xf32>
      tpu.vector_store %arg6[%c0_14, %c0_15], %15 {strides = array<i32>} : memref<8x128xf32, #tpu.memory_space<vmem>>, vector<8x128xf32>,
    } else {
    }
    return
  }
  func.func @transform_0(%arg0: i32, %arg1: i32, %arg2: i32) -> (i32, i32) {
    %c0_i32 = arith.constant 0 : i32
    return %arg0, %arg2 : i32, i32
  }
  func.func @transform_1(%arg0: i32, %arg1: i32, %arg2: i32) -> (i32, i32) {
    %c0_i32 = arith.constant 0 : i32
    return %arg2, %arg1 : i32, i32
  }
  func.func @transform_2(%arg0: i32, %arg1: i32, %arg2: i32) -> (i32, i32) {
    %c0_i32 = arith.constant 0 : i32
    %c0_i32_0 = arith.constant 0 : i32
    return %c0_i32, %arg1 : i32, i32
  }
  func.func @transform_3(%arg0: i32, %arg1: i32, %arg2: i32) -> (i32, i32) {
    %c0_i32 = arith.constant 0 : i32
    return %arg0, %arg1 : i32, i32
  }
}

</mosaic_0001>

<bundles_post_ra>
// kernel: ste_linear_forward.1
= control target key start
LH: loop header
LB: loop body
LE: loop exit
PB: predicated region body
PF: predicated region fallthrough
CT: control target
= control target key end

     0   :  { %v1193_v3 = vmov 0.0|0.0   ;;  %vm1194_vm0 = vmmov 0   ;;  %v1195_v14 = vmov 0.0   ;;  %s1542_s0 = inlined_call_operand.vmem [shape: f32[8,128], index: 0, kind: input, shape index: {}]   ;;  %s1543_s1 = inlined_call_operand.vmem [shape: f32[128,128], index: 1, kind: input, shape index: {}]   ;;  %s1544_s2 = inlined_call_operand.vmem [shape: f32[1,128], index: 2, kind: input, shape index: {}]   ;;  %s1545_s3 = inlined_call_operand.hbm [shape: f32[8,128], index: 3, kind: output, shape index: {}]  }
   0x1   :  { %v22_v0 = vld [vmem:[%s1543_s1] sm:$0xff]  ;;  %v23_v1 = vld [vmem:[%s1543_s1 + $0x8] sm:$0xff]  ;;  %v24_v2 = vld [vmem:[%s1543_s1 + $0x10] sm:$0xff]  ;;  %1021 = vmatprep.subr.bf16.mxu0 %v1193_v3  ;;  %1045 = vmatprep.subr.bf16.mxu1 %v1193_v3 }
   0x2   :  { %v39_v4 = vand.u32 4294901760, %v22_v0  ;;  %v42_v5 = vand.u32 4294901760, %v23_v1  ;;  %v25_v6 = vld [vmem:[%s1543_s1 + $0x18] sm:$0xff]  ;;  %v45_v7 = vand.u32 4294901760, %v24_v2  ;;  %v26_v8 = vld [vmem:[%s1543_s1 + $0x20] sm:$0xff]  ;;  %v27_v9 = vld [vmem:[%s1543_s1 + $0x28] sm:$0xff]  ;;  %843 = vmatprep.mubr.msk.f32.mxu0 %vm1194_vm0, %v1195_v14  ;;  %878 = vmatprep.mubr.msk.f32.mxu1 %vm1194_vm0, %v1195_v14 }
   0x3   :  { %v48_v10 = vand.u32 4294901760, %v25_v6  ;;  %v51_v11 = vand.u32 4294901760, %v26_v8  ;;  %v54_v12 = vand.u32 4294901760, %v27_v9  ;;  %v28_v13 = vld [vmem:[%s1543_s1 + $0x30] sm:$0xff]  ;;  %v29_v19 = vld [vmem:[%s1543_s1 + $0x38] sm:$0xff]  ;;  %v30_v20 = vld [vmem:[%s1543_s1 + $0x40] sm:$0xff] }
   0x4   :  { %v1244_v15 = vpack.c.bf16 %v42_v5, %v39_v4  ;;  %v1246_v16 = vsub.f32 %v22_v0, %v39_v4  ;;  %v1248_v17 = vsub.f32 %v23_v1, %v42_v5  ;;  %v1250_v18 = vsub.f32 %v24_v2, %v45_v7  ;;  %v31_v27 = vld [vmem:[%s1543_s1 + $0x48] sm:$0xff] }
   0x5   :  { %v1258_v21 = vpack.c.bf16 %v48_v10, %v45_v7  ;;  %v1260_v22 = vsub.f32 %v25_v6, %v48_v10  ;;  %v1263_v23 = vsub.f32 %v26_v8, %v51_v11  ;;  %v57_v26 = vand.u32 4294901760, %v28_v13 }
   0x6   :  { %1023 = vmatpush3.bf16.msra.mxu0 %v1244_v15  ;;  %v132_v24 = vand.u32 4294901760, %v1246_v16  ;;  %v139_v25 = vand.u32 4294901760, %v1248_v17  ;;  %v60_v28 = vand.u32 4294901760, %v29_v19  ;;  %v146_v29 = vand.u32 4294901760, %v1250_v18 }
   0x7   :  { %1024 = vmatprep.subr.bf16.mxu0 %v1193_v3  ;;  %v153_v30 = vand.u32 4294901760, %v1260_v22  ;;  %v63_v31 = vand.u32 4294901760, %v30_v20 }
   0x8   :  { %8 = vsyncpa [#allocation3], 0  ;;  %v1273_v32 = vsub.f32 %v27_v9, %v54_v12  ;;  %v133_v33 = vsub.f32 %v1246_v16, %v132_v24  ;;  %v140_v34 = vsub.f32 %v1248_v17, %v139_v25  ;;  %v1281_v35 = vsub.f32 %v28_v13, %v57_v26  ;;  %v32_v40 = vld [vmem:[%s1543_s1 + $0x50] sm:$0xff]  ;;  %v33_v41 = vld [vmem:[%s1543_s1 + $0x58] sm:$0xff]  ;;  %s1196_s19 = smov [#allocation2]  }
   0x9   :  { %v1283_v36 = vsub.f32 %v29_v19, %v60_v28  ;;  %v147_v37 = vsub.f32 %v1250_v18, %v146_v29  ;;  %v154_v38 = vsub.f32 %v1260_v22, %v153_v30  ;;  %v66_v39 = vand.u32 4294901760, %v31_v27  ;;  %v34_v50 = vld [vmem:[%s1543_s1 + $0x60] sm:$0xff]  ;;  %v35_v59 = vld [vmem:[%s1543_s1 + $0x68] sm:$0xff]  ;;  %v36_v0 = vld [vmem:[%s1543_s1 + $0x70] sm:$0xff]  ;;  %s700_s20 = sshll.u32 %s1196_s19, 4  ;;  %s701_s20 = int_to_ptr.vmem [resolvable:$true] %s700_s20 }
   0xa   :  { %1026 = vmatpush3.bf16.msra.mxu0 %v1258_v21  ;;  %v1298_v42 = vpack.c.bf16 %v54_v12, %v51_v11  ;;  %v134_v43 = vand.u32 4294901760, %v133_v33  ;;  %v141_v44 = vand.u32 4294901760, %v140_v34  ;;  %v1300_v45 = vpack.c.bf16 %v60_v28, %v57_v26  ;;  %v37_v6 = vld [vmem:[%s1543_s1 + $0x78] sm:$0xff]  ;;  %s1169_s21 = scalar_lea.vmem %s701_s20, 128  ;;  %p1174_p1 = scmp.lt.s32.totalorder %s701_s20, %s701_s20 }
   0xb   :  { %1027 = vmatprep.subr.bf16.mxu0 %v1193_v3  ;;  %v148_v46 = vand.u32 4294901760, %v147_v37  ;;  %v155_v47 = vand.u32 4294901760, %v154_v38  ;;  %v1303_v48 = vsub.f32 %v30_v20, %v63_v31  ;;  %v160_v49 = vand.u32 4294901760, %v1263_v23  ;;  %p1170_p0 = scmp.ne.s32.totalorder %s701_s20, %s1169_s21  ;;  %p1175_p2 = scmp.lt.s32.totalorder %s1169_s21, %s1169_s21 }
   0xc   :  { %v1046_v51 = vpack.c.bf16 %v141_v44, %v134_v43  ;;  %v167_v52 = vand.u32 4294901760, %v1273_v32  ;;  %v69_v53 = vand.u32 4294901760, %v32_v40  ;;  %v72_v54 = vand.u32 4294901760, %v33_v41 }
   0xd   :  { %v1310_v55 = vsub.f32 %v31_v27, %v66_v39  ;;  %v161_v56 = vsub.f32 %v1263_v23, %v160_v49  ;;  %v174_v57 = vand.u32 4294901760, %v1281_v35  ;;  %v181_v58 = vand.u32 4294901760, %v1283_v36  ;;  %p1176_p3 = por %p1175_p2, %p1174_p1 }
   0xe   :  { %1029 = vmatpush3.bf16.msra.mxu0 %v1298_v42  ;;  %1047 = vmatpush3.bf16.msra.mxu1 %v1046_v51  ;;  %v1049_v60 = vpack.c.bf16 %v155_v47, %v148_v46  ;;  %v1321_v61 = vpack.c.bf16 %v66_v39, %v63_v31  ;;  %v168_v62 = vsub.f32 %v1273_v32, %v167_v52  ;;  %v75_v63 = vand.u32 4294901760, %v34_v50  ;;  %v21_v31 = vld [vmem:[%s1542_s0] sm:$0xff] }
   0xf   :  { %1030 = vmatprep.subr.bf16.mxu0 %v1193_v3  ;;  %1048 = vmatprep.subr.bf16.mxu1 %v1193_v3  ;;  %v162_v1 = vand.u32 4294901760, %v161_v56  ;;  %v1331_v2 = vsub.f32 %v32_v40, %v69_v53  ;;  %v175_v4 = vsub.f32 %v1281_v35, %v174_v57  ;;  %v182_v5 = vsub.f32 %v1283_v36, %v181_v58  ;;  %p1177_p4 = pnand %p1176_p3, %p1170_p0 }
  0x10   :  { %v169_v7 = vand.u32 4294901760, %v168_v62  ;;  %v1342_v8 = vsub.f32 %v33_v41, %v72_v54  ;;  %v78_v9 = vand.u32 4294901760, %v35_v59  ;;  %v188_v10 = vand.u32 4294901760, %v1303_v48 }
  0x11   :  { %v176_v11 = vand.u32 4294901760, %v175_v4  ;;  %v183_v12 = vand.u32 4294901760, %v182_v5  ;;  %v195_v13 = vand.u32 4294901760, %v1310_v55  ;;  %v81_v19 = vand.u32 4294901760, %v36_v0 }
  0x12   :  { %1032 = vmatpush3.bf16.msra.mxu0 %v1300_v45  ;;  %1050 = vmatpush3.bf16.msra.mxu1 %v1049_v60  ;;  %v1052_v20 = vpack.c.bf16 %v169_v7, %v162_v1  ;;  %v1347_v26 = vsub.f32 %v34_v50, %v75_v63  ;;  %v1349_v27 = vsub.f32 %v35_v59, %v78_v9  ;;  %v84_v28 = vand.u32 4294901760, %v37_v6 }
  0x13   :  { %1033 = vmatprep.subr.bf16.mxu0 %v1193_v3  ;;  %1051 = vmatprep.subr.bf16.mxu1 %v1193_v3  ;;  %v189_v33 = vsub.f32 %v1303_v48, %v188_v10  ;;  %v196_v34 = vsub.f32 %v1310_v55, %v195_v13  ;;  %v202_v37 = vand.u32 4294901760, %v1331_v2  ;;  %v1363_v38 = vpack.c.bf16 %v72_v54, %v69_v53 }
  0x14   :  { %v1055_v39 = vpack.c.bf16 %v183_v12, %v176_v11  ;;  %v1365_v40 = vsub.f32 %v36_v0, %v81_v19  ;;  %v209_v41 = vand.u32 4294901760, %v1342_v8  ;;  %v1371_v47 = vand.u32 4294901760, %v21_v31 }
  0x15   :  { %v190_v43 = vand.u32 4294901760, %v189_v33  ;;  %v197_v44 = vand.u32 4294901760, %v196_v34  ;;  %v203_v46 = vsub.f32 %v1331_v2, %v202_v37  ;;  %v1374_v50 = vsub.f32 %v37_v6, %v84_v28 }
  0x16   :  { %1035 = vmatpush3.bf16.msra.mxu0 %v1321_v61  ;;  %1053 = vmatpush3.bf16.msra.mxu1 %v1052_v20  ;;  %v210_v51 = vsub.f32 %v1342_v8, %v209_v41  ;;  %v216_v53 = vand.u32 4294901760, %v1347_v26  ;;  %v223_v54 = vand.u32 4294901760, %v1349_v27  ;;  %v1384_v56 = vsub.f32 %v21_v31, %v1371_v47 }
  0x17   :  { %1036 = vmatprep.subr.bf16.mxu0 %v1193_v3  ;;  %1054 = vmatprep.subr.bf16.mxu1 %v1193_v3  ;;  %v1386_v59 = vpack.c.bf16 %v78_v9, %v75_v63  ;;  %v1058_v60 = vpack.c.bf16 %v197_v44, %v190_v43  ;;  %v204_v62 = vand.u32 4294901760, %v203_v46  ;;  %v230_v1 = vand.u32 4294901760, %v1365_v40 }
  0x18   :  { %v121_v0 = vand.u32 4294901760, %v1384_v56  ;;  %v211_v4 = vand.u32 4294901760, %v210_v51  ;;  %v217_v5 = vsub.f32 %v1347_v26, %v216_v53  ;;  %v224_v6 = vsub.f32 %v1349_v27, %v223_v54 }
  0x19   :  { %v237_v63 = vand.u32 4294901760, %v1374_v50  ;;  %v1400_v7 = vpack.c.bf16 %v84_v28, %v81_v19  ;;  %v231_v11 = vsub.f32 %v1365_v40, %v230_v1  ;;  %v1070_v34 = vpack.c.bf16 %v1248_v17, %v1246_v16 }
  0x1a   :  { %1038 = vmatpush3.bf16.msra.mxu0 %v1363_v38  ;;  %1056 = vmatpush3.bf16.msra.mxu1 %v1055_v39  ;;  %v122_v9 = vsub.f32 %v1384_v56, %v121_v0  ;;  %v1061_v12 = vpack.c.bf16 %v211_v4, %v204_v62  ;;  %v218_v20 = vand.u32 4294901760, %v217_v5  ;;  %v225_v31 = vand.u32 4294901760, %v224_v6 }
  0x1b   :  { %1039 = vmatprep.subr.bf16.mxu0 %v1193_v3  ;;  %1057 = vmatprep.subr.bf16.mxu1 %v1193_v3  ;;  %v238_v33 = vsub.f32 %v1374_v50, %v237_v63  ;;  %v232_v39 = vand.u32 4294901760, %v231_v11  ;;  %v1073_v46 = vpack.c.bf16 %v1260_v22, %v1250_v18  ;;  %v1076_v51 = vpack.c.bf16 %v1273_v32, %v1263_v23 }
  0x1c   :  { %v123_v19 = vand.u32 4294901760, %v122_v9  ;;  %v1064_v28 = vpack.c.bf16 %v225_v31, %v218_v20  ;;  %v1082_v62 = vpack.c.bf16 %v1310_v55, %v1303_v48  ;;  %v1085_v4 = vpack.c.bf16 %v1342_v8, %v1331_v2 }
  0x1d   :  { %v239_v43 = vand.u32 4294901760, %v238_v33  ;;  %v1088_v5 = vpack.c.bf16 %v1349_v27, %v1347_v26  ;;  %v1091_v6 = vpack.c.bf16 %v1374_v50, %v1365_v40  ;;  %v1118_v9 = vpack.c.bf16 %v139_v25, %v132_v24 }
  0x1e   :  { %1041 = vmatpush3.bf16.msra.mxu0 %v1386_v59  ;;  %1059 = vmatpush3.bf16.msra.mxu1 %v1058_v60  ;;  %v1079_v60 = vpack.c.bf16 %v1283_v36, %v1281_v35  ;;  %v1121_v11 = vpack.c.bf16 %v153_v30, %v146_v29  ;;  %v1124_v16 = vpack.c.bf16 %v167_v52, %v160_v49 }
  0x1f   :  { %1042 = vmatprep.subr.bf16.mxu0 %v1193_v3  ;;  %1060 = vmatprep.subr.bf16.mxu1 %v1193_v3  ;;  %v1067_v44 = vpack.c.bf16 %v239_v43, %v232_v39  ;;  %v1127_v17 = vpack.c.bf16 %v181_v58, %v174_v57  ;;  %v1136_v18 = vpack.c.bf16 %v223_v54, %v216_v53  ;;  %v708_v58 = vld [vmem:[%s1544_s2] ss:$0 sm:$0xff] }
  0x22   :  { %1044 = vmatpush3.bf16.msra.mxu0 %v1400_v7  ;;  %1062 = vmatpush3.bf16.msra.mxu1 %v1061_v12 }
  0x23   :  { %1063 = vmatprep.subr.bf16.mxu1 %v1193_v3  ;;  %1069 = vmatprep.subr.bf16.mxu0 %v1193_v3 }
  0x25   :  { %844 = vmatmul.mubr.f32.vlgmr.msra.gmra.mrb[0].mxu0 %v123_v19 }
  0x26   :  { %1065 = vmatpush3.bf16.msra.mxu1 %v1064_v28  ;;  %1071 = vmatpush3.bf16.msra.mxu0 %v1070_v34 }
  0x27   :  { %1066 = vmatprep.subr.bf16.mxu1 %v1193_v3  ;;  %1072 = vmatprep.subr.bf16.mxu0 %v1193_v3 }
  0x28   :  { %913 = vmatprep.mubr.msk.f32.mxu0 %vm1194_vm0, %v1195_v14 }
  0x2a   :  { %1068 = vmatpush3.bf16.msra.mxu1 %v1067_v44  ;;  %1074 = vmatpush3.bf16.msra.mxu0 %v1073_v46 }
  0x2b   :  { %1075 = vmatprep.subr.bf16.mxu0 %v1193_v3  ;;  %1093 = vmatprep.subr.bf16.mxu1 %v1193_v3 }
  0x2d   :  { %879 = vmatmul.mubr.f32.vlgmr.msra.gmra.mrb[0].mxu1 %v1371_v47 }
  0x2e   :  { %1077 = vmatpush3.bf16.msra.mxu0 %v1076_v51  ;;  %1095 = vmatpush3.bf16.msra.mxu1 %v1244_v15 }
  0x2f   :  { %1078 = vmatprep.subr.bf16.mxu0 %v1193_v3  ;;  %1096 = vmatprep.subr.bf16.mxu1 %v1193_v3 }
  0x30   :  { %948 = vmatprep.mubr.msk.f32.mxu1 %vm1194_vm0, %v1195_v14 }
  0x32   :  { %1080 = vmatpush3.bf16.msra.mxu0 %v1079_v60  ;;  %1098 = vmatpush3.bf16.msra.mxu1 %v1258_v21 }
  0x33   :  { %1081 = vmatprep.subr.bf16.mxu0 %v1193_v3  ;;  %1099 = vmatprep.subr.bf16.mxu1 %v1193_v3 }
  0x36   :  { %1083 = vmatpush3.bf16.msra.mxu0 %v1082_v62  ;;  %1101 = vmatpush3.bf16.msra.mxu1 %v1298_v42 }
  0x37   :  { %1084 = vmatprep.subr.bf16.mxu0 %v1193_v3  ;;  %1102 = vmatprep.subr.bf16.mxu1 %v1193_v3 }
  0x3a   :  { %1086 = vmatpush3.bf16.msra.mxu0 %v1085_v4  ;;  %1104 = vmatpush3.bf16.msra.mxu1 %v1300_v45 }
  0x3b   :  { %1087 = vmatprep.subr.bf16.mxu0 %v1193_v3  ;;  %1105 = vmatprep.subr.bf16.mxu1 %v1193_v3 }
  0x3e   :  { %1089 = vmatpush3.bf16.msra.mxu0 %v1088_v5  ;;  %1107 = vmatpush3.bf16.msra.mxu1 %v1321_v61 }
  0x3f   :  { %1090 = vmatprep.subr.bf16.mxu0 %v1193_v3  ;;  %1108 = vmatprep.subr.bf16.mxu1 %v1193_v3 }
  0x42   :  { %1092 = vmatpush3.bf16.msra.mxu0 %v1091_v6  ;;  %1110 = vmatpush3.bf16.msra.mxu1 %v1363_v38 }
  0x43   :  { %1111 = vmatprep.subr.bf16.mxu1 %v1193_v3  ;;  %1117 = vmatprep.subr.bf16.mxu0 %v1193_v3 }
  0x45   :  { %914 = vmatmul.mubr.f32.vlgmr.msra.gmra.mrb[2].mxu0 %v1384_v56 }
  0x46   :  { %1113 = vmatpush3.bf16.msra.mxu1 %v1386_v59  ;;  %1119 = vmatpush3.bf16.msra.mxu0 %v1118_v9 }
  0x47   :  { %1114 = vmatprep.subr.bf16.mxu1 %v1193_v3  ;;  %1120 = vmatprep.subr.bf16.mxu0 %v1193_v3 }
  0x48   :  { %983 = vmatprep.mubr.msk.f32.mxu0 %vm1194_vm0, %v1195_v14 }
  0x4a   :  { %1116 = vmatpush3.bf16.msra.mxu1 %v1400_v7  ;;  %1122 = vmatpush3.bf16.msra.mxu0 %v1121_v11 }
  0x4b   :  { %1123 = vmatprep.subr.bf16.mxu0 %v1193_v3  ;;  %1141 = vmatprep.subr.bf16.mxu1 %v1193_v3 }
  0x4d   :  { %949 = vmatmul.mubr.f32.vlgmr.msra.gmra.mrb[2].mxu1 %v121_v0 }
  0x4e   :  { %1125 = vmatpush3.bf16.msra.mxu0 %v1124_v16  ;;  %1143 = vmatpush3.bf16.msra.mxu1 %v1244_v15  ;;  %v1130_v15 = vpack.c.bf16 %v195_v13, %v188_v10 }
  0x4f   :  { %1126 = vmatprep.subr.bf16.mxu0 %v1193_v3  ;;  %1144 = vmatprep.subr.bf16.mxu1 %v1193_v3 }
  0x50   :  { %1018 = vmatprep.mubr.msk.f32.mxu1 %vm1194_vm0, %v1195_v14  ;;  %v1133_v14 = vpack.c.bf16 %v209_v41, %v202_v37 }
  0x52   :  { %1128 = vmatpush3.bf16.msra.mxu0 %v1127_v17  ;;  %1146 = vmatpush3.bf16.msra.mxu1 %v1258_v21  ;;  %v1139_v21 = vpack.c.bf16 %v237_v63, %v230_v1 }
  0x53   :  { %1129 = vmatprep.subr.bf16.mxu0 %v1193_v3  ;;  %1147 = vmatprep.subr.bf16.mxu1 %v1193_v3 }
  0x56   :  { %1131 = vmatpush3.bf16.msra.mxu0 %v1130_v15  ;;  %1149 = vmatpush3.bf16.msra.mxu1 %v1298_v42 }
  0x57   :  { %1132 = vmatprep.subr.bf16.mxu0 %v1193_v3  ;;  %1150 = vmatprep.subr.bf16.mxu1 %v1193_v3 }
  0x5a   :  { %1134 = vmatpush3.bf16.msra.mxu0 %v1133_v14  ;;  %1152 = vmatpush3.bf16.msra.mxu1 %v1300_v45 }
  0x5b   :  { %1135 = vmatprep.subr.bf16.mxu0 %v1193_v3  ;;  %1153 = vmatprep.subr.bf16.mxu1 %v1193_v3 }
  0x5e   :  { %1137 = vmatpush3.bf16.msra.mxu0 %v1136_v18  ;;  %1155 = vmatpush3.bf16.msra.mxu1 %v1321_v61 }
  0x5f   :  { %1138 = vmatprep.subr.bf16.mxu0 %v1193_v3  ;;  %1156 = vmatprep.subr.bf16.mxu1 %v1193_v3 }
  0x62   :  { %1140 = vmatpush3.bf16.msra.mxu0 %v1139_v21  ;;  %1158 = vmatpush3.bf16.msra.mxu1 %v1363_v38 }
  0x63   :  { %1159 = vmatprep.subr.bf16.mxu1 %v1193_v3 }
  0x65   :  { %984 = vmatmul.mubr.f32.vlgmr.msra.gmra.mrb[4].mxu0 %v1371_v47 }
  0x66   :  { %1161 = vmatpush3.bf16.msra.mxu1 %v1386_v59 }
  0x67   :  { %1162 = vmatprep.subr.bf16.mxu1 %v1193_v3 }
  0x6a   :  { %1164 = vmatpush3.bf16.msra.mxu1 %v1400_v7 }
  0x6d   :  { %1019 = vmatmul.mubr.f32.vlgmr.msra.gmra.mrb[4].mxu1 %v1371_v47 }
  0xf8   :  { %v125_v22 = vpop.f32.mrb[0].mxu0 }
  0xf9   :  { %v845_v23 = vpop.f32.mrb[1].mxu0 }
 0x100   :  { %v276_v24 = vpop.f32.mrb[0].mxu1 }
 0x101   :  { %v277_v25 = vadd.f32 %v276_v24, %v125_v22  ;;  %v880_v29 = vpop.f32.mrb[1].mxu1 }
 0x118   :  { %v380_v30 = vpop.f32.mrb[2].mxu0 }
 0x119   :  { %v381_v32 = vadd.f32 %v380_v30, %v277_v25  ;;  %v915_v35 = vpop.f32.mrb[3].mxu0 }
 0x120   :  { %v469_v36 = vpop.f32.mrb[2].mxu1 }
 0x121   :  { %v470_v42 = vadd.f32 %v469_v36, %v381_v32  ;;  %v950_v45 = vpop.f32.mrb[3].mxu1 }
 0x138   :  { %v588_v48 = vpop.f32.mrb[4].mxu0 }
 0x139   :  { %v589_v49 = vadd.f32 %v588_v48, %v470_v42  ;;  %v985_v52 = vpop.f32.mrb[5].mxu0 }
 0x140   :  { %v675_v55 = vpop.f32.mrb[4].mxu1 }
 0x141   :  { %v676_v3 = vadd.f32 %v675_v55, %v589_v49  ;;  %v1020_v57 = vpop.f32.mrb[5].mxu1 }
 0x143   :  { %v692_v61 = vadd.f32 %v708_v58, %v676_v3 }
 0x145   :  { %693 = vst [vmem:[#allocation2] sm:$0xff] %v692_v61 }
 0x146   :  { %1180 = shalt.err (!%p1177_p4)
}
 0x147   :  { %s1181_s24 = scalar_lea.hbm %s1545_s3, 128 }
 0x148   :  { %p1182_p5 = scmp.ne.s32.totalorder %s1545_s3, %s1181_s24  ;;  %p1185_p6 = scmp.lt.u32.totalorder %s1181_s24, %s1545_s3 }
 0x14a   :  { %p1187_p7 = pnand %p1185_p6, %p1182_p5 }
 0x14c   :  { %1190 = shalt.err (!%p1187_p7)
}
 0x14d   :  { %703 = dma.vmem_to_hbm [thread:$0]  %s701_s20, 128, %s1545_s3, [#allocation3]  }
 0x14e   :  { %1191 = dma.done.wait [#allocation3], 128  }
 0x14f   :  { %1192 = vsyncadd [#allocation3], 4294967168 }
 0x150   :  { %707 = vsyncpa [#allocation3], 1 }

</bundles_post_ra>
